<compile_context>
chip_gen: v5e
topology: v5e:2x2
jax: 0.10.0
libtpu: 0.0.40
codegen_flags: <defaults>
</compile_context>

<pallas_src>
import jax
import jax.numpy as jnp
from jax.experimental import pallas as pl
from jax.experimental.pallas import tpu as pltpu


def _round_up(x, m):
    return ((x + m - 1) // m) * m


# ----------------------------- kernels --------------------------------------


def _ffn_kernel_direct(x_ref, w1_ref, b1_ref, w2_ref, b2_ref, o_ref):
    # Whole hidden dim in one tile: no scratch, no reduction bookkeeping.
    h = jnp.dot(x_ref[...], w1_ref[...], preferred_element_type=jnp.float32)
    h = jnp.maximum(h + b1_ref[...], 0.0)
    out = jnp.dot(h.astype(w2_ref.dtype), w2_ref[...],
                  preferred_element_type=jnp.float32) + b2_ref[...]
    o_ref[...] = out.astype(o_ref.dtype)


def _ffn_kernel_stream(x_ref, w1_ref, b1_ref, w2_ref, b2_ref, o_ref, acc_ref):
    k = pl.program_id(1)

    @pl.when(k == 0)
    def _init():
        acc_ref[...] = jnp.zeros_like(acc_ref)

    # Layer 1 on this hidden tile: (tb, in) @ (in, th) -> f32 (MXU).
    h = jnp.dot(x_ref[...], w1_ref[...], preferred_element_type=jnp.float32)
    # Bias + ReLU in f32 on the VPU (b1 tile matches this hidden tile).
    h = jnp.maximum(h + b1_ref[...], 0.0)

    # Layer 2 contribution of this hidden tile, accumulated in f32 scratch.
    acc_ref[...] += jnp.dot(h.astype(w2_ref.dtype), w2_ref[...],
                            preferred_element_type=jnp.float32)

    @pl.when(k == pl.num_programs(1) - 1)
    def _finalize():
        # b2 added exactly once, at finalize.
        o_ref[...] = (acc_ref[...] + b2_ref[...]).astype(o_ref.dtype)


# ----------------------------- wrapper ---------------------------------------


def feedforward(x, w1, b1, w2, b2, *, block_batch=256, block_hidden=512,
                compute_dtype=jnp.bfloat16):
    """Fused Linear -> ReLU -> Linear.

    x:  (B, inputs) f32
    w1: (inputs, hidden), b1: (1, hidden)      (w1 = PyTorch l1.weight.T)
    w2: (hidden, classes), b2: (1, classes)    (w2 = PyTorch l2.weight.T)
    returns (B, classes) in x.dtype
    """
    B, inputs = x.shape
    hidden = w1.shape[1]
    classes = w2.shape[1]
    out_dtype = x.dtype

    itemsize = jnp.dtype(compute_dtype).itemsize
    out_itemsize = jnp.dtype(out_dtype).itemsize
    sub = 8 * (4 // itemsize)  # sublane pack: 8 for f32, 16 for bf16

    # Lane-dense padding of feature dims (multiples of 128).
    inputs_p = _round_up(inputs, 128)
    classes_p = _round_up(classes, 128)

    # Batch tile: multiple of the sublane pack; no bigger than needed.
    block_batch = max(sub, min(block_batch, _round_up(B, sub)))
    block_batch = _round_up(block_batch, sub)

    # Hidden (reduction) tile: multiple of 128; no bigger than needed.
    block_hidden = max(128, min(block_hidden, _round_up(hidden, 128)))
    block_hidden = _round_up(block_hidden, 128)

    # Keep the double-buffered working set well under the scoped-VMEM limit
    # (conservative 20 MiB budget so it also fits v7x defaults).
    def vmem_bytes(bb, bh):
        tiles = (bb * inputs_p + inputs_p * bh + bh * classes_p) * itemsize
        tiles += (bh + classes_p) * 4                 # f32 bias tiles
        tiles += bb * classes_p * out_itemsize        # output tile
        return 2 * tiles + bb * classes_p * 4         # double-buffer + acc

    budget = 20 * 1024 * 1024
    while vmem_bytes(block_batch, block_hidden) > budget and block_hidden > 128:
        block_hidden //= 2
    while vmem_bytes(block_batch, block_hidden) > budget and block_batch > sub:
        block_batch = max(sub, block_batch // 2)

    B_p = _round_up(B, block_batch)
    hidden_p = _round_up(hidden, block_hidden)

    # Zero-pad (zero rows/cols contribute nothing through matmul / zero-bias ReLU).
    xp = jnp.zeros((B_p, inputs_p), compute_dtype).at[:B, :inputs].set(
        x.astype(compute_dtype))
    w1p = jnp.zeros((inputs_p, hidden_p), compute_dtype).at[:inputs, :hidden].set(
        w1.astype(compute_dtype))
    b1p = jnp.zeros((1, hidden_p), jnp.float32).at[:, :hidden].set(
        b1.astype(jnp.float32))
    w2p = jnp.zeros((hidden_p, classes_p), compute_dtype).at[:hidden, :classes].set(
        w2.astype(compute_dtype))
    b2p = jnp.zeros((1, classes_p), jnp.float32).at[:, :classes].set(
        b2.astype(jnp.float32))

    nb = B_p // block_batch
    nk = hidden_p // block_hidden

    flops = 2 * B_p * (inputs_p * hidden_p + hidden_p * classes_p)
    bytes_accessed = (xp.size * itemsize + w1p.size * itemsize
                      + w2p.size * itemsize + b1p.size * 4 + b2p.size * 4
                      + B_p * classes_p * out_itemsize)
    cost = pl.CostEstimate(flops=flops, transcendentals=0,
                           bytes_accessed=bytes_accessed)

    if nk == 1:
        # Fast path: whole hidden dim resident -> scratch-free single pass.
        grid_spec = pltpu.PrefetchScalarGridSpec(
            num_scalar_prefetch=0,
            grid=(nb,),
            in_specs=[
                pl.BlockSpec((block_batch, inputs_p), lambda i: (i, 0)),
                pl.BlockSpec((inputs_p, hidden_p), lambda i: (0, 0)),
                pl.BlockSpec((1, hidden_p), lambda i: (0, 0)),
                pl.BlockSpec((hidden_p, classes_p), lambda i: (0, 0)),
                pl.BlockSpec((1, classes_p), lambda i: (0, 0)),
            ],
            out_specs=pl.BlockSpec((block_batch, classes_p), lambda i: (i, 0)),
        )
        out_p = pl.pallas_call(
            _ffn_kernel_direct,
            out_shape=jax.ShapeDtypeStruct((B_p, classes_p), out_dtype),
            grid_spec=grid_spec,
            compiler_params=pltpu.CompilerParams(
                dimension_semantics=("parallel",)),
            cost_estimate=cost,
        )(xp, w1p, b1p, w2p, b2p)
    else:
        grid_spec = pltpu.PrefetchScalarGridSpec(
            num_scalar_prefetch=0,
            grid=(nb, nk),
            in_specs=[
                # x tile: changes only with batch index (no re-DMA across k).
                pl.BlockSpec((block_batch, inputs_p), lambda i, k: (i, 0)),
                # w1 column tile / b1 tile stream along the hidden axis.
                pl.BlockSpec((inputs_p, block_hidden), lambda i, k: (0, k)),
                pl.BlockSpec((1, block_hidden), lambda i, k: (0, k)),
                # w2 row tile streams along the hidden axis.
                pl.BlockSpec((block_hidden, classes_p), lambda i, k: (k, 0)),
                # b2 is tiny and constant across the grid.
                pl.BlockSpec((1, classes_p), lambda i, k: (0, 0)),
            ],
            out_specs=pl.BlockSpec((block_batch, classes_p),
                                   lambda i, k: (i, 0)),
            scratch_shapes=[pltpu.VMEM((block_batch, classes_p), jnp.float32)],
        )
        out_p = pl.pallas_call(
            _ffn_kernel_stream,
            out_shape=jax.ShapeDtypeStruct((B_p, classes_p), out_dtype),
            grid_spec=grid_spec,
            compiler_params=pltpu.CompilerParams(
                dimension_semantics=("parallel", "arbitrary")),
            cost_estimate=cost,
        )(xp, w1p, b1p, w2p, b2p)

    return out_p[:B, :classes]


# ----------------------------- test ------------------------------------------


def _make_params(key, inputs, hidden, classes):
    kw1, kb1, kw2, kb2 = jax.random.split(key, 4)
    bound1 = 1.0 / jnp.sqrt(jnp.float32(inputs))
    w1 = jax.random.uniform(kw1, (inputs, hidden), jnp.float32, -bound1, bound1)
    b1 = jax.random.uniform(kb1, (1, hidden), jnp.float32, -bound1, bound1)
    bound2 = 1.0 / jnp.sqrt(jnp.float32(hidden))
    w2 = jax.random.uniform(kw2, (hidden, classes), jnp.float32, -bound2, bound2)
    b2 = jax.random.uniform(kb2, (1, classes), jnp.float32, -bound2, bound2)
    return w1, b1, w2, b2


def _check(x, w1, b1, w2, b2, **kw):
    out = jax.block_until_ready(feedforward(x, w1, b1, w2, b2, **kw))
    assert out.shape == (x.shape[0], w2.shape[1])

    # Reference using the same bf16-operand / f32-accumulate matmul recipe.
    xc, w1c, w2c = (a.astype(jnp.bfloat16) for a in (x, w1, w2))
    h_ref = jnp.maximum(
        jnp.dot(xc, w1c, preferred_element_type=jnp.float32) + b1, 0.0)
    ref_bf16 = jnp.dot(h_ref.astype(jnp.bfloat16), w2c,
                       preferred_element_type=jnp.float32) + b2
    assert jnp.allclose(out, ref_bf16, atol=2e-3, rtol=2e-3)

    # Full f32 PyTorch-style reference (looser tolerance due to bf16 MXU ops).
    ref_f32 = jnp.maximum(x @ w1 + b1, 0.0) @ w2 + b2
    assert jnp.allclose(out, ref_f32, atol=3e-2, rtol=3e-2)
    return out


if __name__ == "__main__":
    key = jax.random.PRNGKey(0)
    k1, k2, k3, k4 = jax.random.split(key, 4)

    # Small shapes consistent with FeedForward(inputs, hidden, classes):
    # exercises the scratch-free fast path (hidden fits in one tile).
    batch, inputs, hidden, classes = 8, 32, 64, 10
    x = jax.random.normal(k1, (batch, inputs), dtype=jnp.float32)
    w1, b1, w2, b2 = _make_params(k2, inputs, hidden, classes)
    _check(x, w1, b1, w2, b2)

    # Slightly larger config forcing the hidden-streaming (accumulator) path.
    batch2, inputs2, hidden2, classes2 = 64, 48, 384, 10
    x2 = jax.random.normal(k3, (batch2, inputs2), dtype=jnp.float32)
    w1b, b1b, w2b, b2b = _make_params(k4, inputs2, hidden2, classes2)
    _check(x2, w1b, b1b, w2b, b2b, block_hidden=128)

    print("KERNEL_OK")
</pallas_src>

<mosaic_0001>
module attributes {stable_mosaic.version = 11 : i64} {
  func.func @_ffn_kernel_direct(%arg0: i32, %arg1: memref<16x128xbf16, #tpu.memory_space<vmem>>, %arg2: memref<128x128xbf16, #tpu.memory_space<vmem>>, %arg3: memref<1x128xf32, #tpu.memory_space<vmem>>, %arg4: memref<128x128xbf16, #tpu.memory_space<vmem>>, %arg5: memref<1x128xf32, #tpu.memory_space<vmem>>, %arg6: memref<16x128xf32, #tpu.memory_space<vmem>>) attributes {dimension_semantics = [#tpu.dimension_semantics<parallel>], iteration_bounds = array<i64: 1>, scalar_prefetch = 0 : i64, scratch_operands = 0 : i64, tpu.core_type = #tpu.core_type<tc>, window_params = [{transform_indices = @transform_0, window_bounds = array<i64: 16, 128>}, {pipeline_mode = #tpu.pipeline_mode<synchronous>, transform_indices = @transform_1, window_bounds = array<i64: 128, 128>}, {pipeline_mode = #tpu.pipeline_mode<synchronous>, transform_indices = @transform_2, window_bounds = array<i64: 1, 128>}, {pipeline_mode = #tpu.pipeline_mode<synchronous>, transform_indices = @transform_3, window_bounds = array<i64: 128, 128>}, {pipeline_mode = #tpu.pipeline_mode<synchronous>, transform_indices = @transform_4, window_bounds = array<i64: 1, 128>}, {transform_indices = @transform_5, window_bounds = array<i64: 16, 128>}]} {
    %c0 = arith.constant 0 : index
    %c0_0 = arith.constant 0 : index
    %0 = vector.load %arg1[%c0, %c0_0] : memref<16x128xbf16, #tpu.memory_space<vmem>>, vector<16x128xbf16>
    %c0_1 = arith.constant 0 : index
    %c0_2 = arith.constant 0 : index
    %1 = vector.load %arg2[%c0_1, %c0_2] : memref<128x128xbf16, #tpu.memory_space<vmem>>, vector<128x128xbf16>
    %cst = arith.constant dense<0.000000e+00> : vector<16x128xf32>
    %2 = tpu.matmul %0, %1, %cst {dimension_numbers = #tpu.dot_dimension_numbers<[1], [0], [0], [1], [0, 0, 1, 1], [], []>} : vector<16x128xbf16>, vector<128x128xbf16>, vector<16x128xf32> -> vector<16x128xf32>
    %c0_3 = arith.constant 0 : index
    %c0_4 = arith.constant 0 : index
    %3 = vector.load %arg3[%c0_3, %c0_4] : memref<1x128xf32, #tpu.memory_space<vmem>>, vector<1x128xf32>
    %4 = vector.broadcast %3 : vector<1x128xf32> to vector<16x128xf32>
    %5 = arith.addf %2, %4 : vector<16x128xf32>
    %cst_5 = arith.constant 0.000000e+00 : f32
    %6 = vector.broadcast %cst_5 : f32 to vector<16x128xf32>
    %7 = arith.maximumf %5, %6 : vector<16x128xf32>
    %8 = arith.truncf %7 : vector<16x128xf32> to vector<16x128xbf16>
    %c0_6 = arith.constant 0 : index
    %c0_7 = arith.constant 0 : index
    %9 = vector.load %arg4[%c0_6, %c0_7] : memref<128x128xbf16, #tpu.memory_space<vmem>>, vector<128x128xbf16>
    %cst_8 = arith.constant dense<0.000000e+00> : vector<16x128xf32>
    %10 = tpu.matmul %8, %9, %cst_8 {dimension_numbers = #tpu.dot_dimension_numbers<[1], [0], [0], [1], [0, 0, 1, 1], [], []>} : vector<16x128xbf16>, vector<128x128xbf16>, vector<16x128xf32> -> vector<16x128xf32>
    %c0_9 = arith.constant 0 : index
    %c0_10 = arith.constant 0 : index
    %11 = vector.load %arg5[%c0_9, %c0_10] : memref<1x128xf32, #tpu.memory_space<vmem>>, vector<1x128xf32>
    %12 = vector.broadcast %11 : vector<1x128xf32> to vector<16x128xf32>
    %13 = arith.addf %10, %12 : vector<16x128xf32>
    %c0_11 = arith.constant 0 : index
    %c0_12 = arith.constant 0 : index
    %14 = vector.load %arg6[%c0_11, %c0_12] : memref<16x128xf32, #tpu.memory_space<vmem>>, vector<16x128xf32>
    tpu.vector_store %arg6[%c0_11, %c0_12], %13 {strides = array<i32>} : memref<16x128xf32, #tpu.memory_space<vmem>>, vector<16x128xf32>,
    return
  }
  func.func @transform_0(%arg0: i32) -> (i32, i32) {
    %c0_i32 = arith.constant 0 : i32
    %c0_i32_0 = arith.constant 0 : i32
    return %arg0, %c0_i32 : i32, i32
  }
  func.func @transform_1(%arg0: i32) -> (i32, i32) {
    %c0_i32 = arith.constant 0 : i32
    %c0_i32_0 = arith.constant 0 : i32
    %c0_i32_1 = arith.constant 0 : i32
    return %c0_i32, %c0_i32_0 : i32, i32
  }
  func.func @transform_2(%arg0: i32) -> (i32, i32) {
    %c0_i32 = arith.constant 0 : i32
    %c0_i32_0 = arith.constant 0 : i32
    %c0_i32_1 = arith.constant 0 : i32
    return %c0_i32, %c0_i32_0 : i32, i32
  }
  func.func @transform_3(%arg0: i32) -> (i32, i32) {
    %c0_i32 = arith.constant 0 : i32
    %c0_i32_0 = arith.constant 0 : i32
    %c0_i32_1 = arith.constant 0 : i32
    return %c0_i32, %c0_i32_0 : i32, i32
  }
  func.func @transform_4(%arg0: i32) -> (i32, i32) {
    %c0_i32 = arith.constant 0 : i32
    %c0_i32_0 = arith.constant 0 : i32
    %c0_i32_1 = arith.constant 0 : i32
    return %c0_i32, %c0_i32_0 : i32, i32
  }
  func.func @transform_5(%arg0: i32) -> (i32, i32) {
    %c0_i32 = arith.constant 0 : i32
    %c0_i32_0 = arith.constant 0 : i32
    return %arg0, %c0_i32 : i32, i32
  }
}

</mosaic_0001>

<bundles_post_ra>
// kernel: tpu_custom_call.1
= control target key start
LH: loop header
LB: loop body
LE: loop exit
PB: predicated region body
PF: predicated region fallthrough
CT: control target
= control target key end

     0   :  { %10 = vsyncpa [#allocation3], 0  ;;  %s518_s0 = inlined_call_operand.hbm [shape: bf16[16,128], index: 0, kind: input, shape index: {}]   ;;  %s519_s1 = inlined_call_operand.hbm [shape: bf16[128,128], index: 1, kind: input, shape index: {}]   ;;  %s520_s2 = inlined_call_operand.vmem [shape: f32[1,128], index: 2, kind: input, shape index: {}]   ;;  %s521_s3 = inlined_call_operand.hbm [shape: bf16[128,128], index: 3, kind: input, shape index: {}]   ;;  %s522_s4 = inlined_call_operand.vmem [shape: f32[1,128], index: 4, kind: input, shape index: {}]   ;;  %s523_s5 = inlined_call_operand.hbm [shape: f32[16,128], index: 5, kind: output, shape index: {}]  }
   0x1   :  { %11 = vsyncpa [#allocation6], 0 }
   0x2   :  { %12 = vsyncpa [#allocation4], 0  ;;  %s30_s20 = sshll.u32 %s519_s1, 4  ;;  %s462_s21 = smov [#allocation5]   ;;  %s31_s20 = int_to_ptr.hbm [resolvable:$true] %s30_s20 }
   0x3   :  { %s32_s22 = sshll.u32 %s462_s21, 4  ;;  %s17_s25 = sshll.u32 %s518_s0, 4  ;;  %s33_s22 = int_to_ptr.vmem [resolvable:$true] %s32_s22  ;;  %s18_s25 = int_to_ptr.hbm [resolvable:$true] %s17_s25 }
   0x4   :  { %s463_s26 = smov 64   ;;  %s464_s27 = smov 4  }
   0x5   :  { %38 = dma.hbm_to_vmem [thread:$0]  %s31_s20, 1024, %s33_s22, [#allocation6], %s463_s26, %s463_s26, %s464_s27  }
   0x6   :  { %s465_s28 = smov [#allocation2]   ;;  %s45_s7 = sshll.u32 %s521_s3, 4  ;;  %s46_s7 = int_to_ptr.hbm [resolvable:$true] %s45_s7 }
   0x7   :  { %s19_s29 = sshll.u32 %s465_s28, 4  ;;  %s466_s1 = smov [#allocation7]   ;;  %s20_s29 = int_to_ptr.vmem [resolvable:$true] %s19_s29 }
   0x8   :  { %25 = dma.hbm_to_vmem [thread:$0]  %s18_s25, 128, %s20_s29, [#allocation3], %s463_s26, %s463_s26, %s464_s27  }
   0x9   :  { %s47_s8 = sshll.u32 %s466_s1, 4  ;;  %s48_s8 = int_to_ptr.vmem [resolvable:$true] %s47_s8 }
   0xa   :  { %53 = dma.hbm_to_vmem [thread:$0]  %s46_s7, 1024, %s48_s8, [#allocation6], %s463_s26, %s463_s26, %s464_s27  }
   0xb   :  { %456 = dma.done.wait [#allocation3], 128  }
   0xc   :  { %457 = vsyncadd [#allocation3], 4294967168 }
   0xd   :  { %458 = dma.done.wait [#allocation6], 2048  }
   0xe   :  { %459 = vsyncadd [#allocation6], 4294965248  ;;  %v341_v0 = vld [vmem:[#allocation5 + $0x38] sm:$0xff]  ;;  %v340_v1 = vld [vmem:[#allocation5 + $0x30] sm:$0xff]  ;;  %s467_s11 = smov [#allocation8]   ;;  %s468_s15 = smov 128  }
   0xf   :  { %144 = vmatpush.bf16.msra.mxu0 %v341_v0  ;;  %v349_v2 = vld [vmem:[#allocation7 + $0x38] sm:$0xff]  ;;  %v348_v3 = vld [vmem:[#allocation7 + $0x30] sm:$0xff]  ;;  %v339_v4 = vld [vmem:[#allocation5 + $0x28] sm:$0xff]  ;;  %s249_s12 = sshll.u32 %s467_s11, 4  ;;  %s469_s16 = smov 8   ;;  %s250_s12 = int_to_ptr.vmem [resolvable:$true] %s249_s12 }
  0x10   :  { %229 = vmatpush.bf16.msra.mxu1 %v349_v2  ;;  %v347_v5 = vld [vmem:[#allocation7 + $0x28] sm:$0xff]  ;;  %v338_v6 = vld [vmem:[#allocation5 + $0x20] sm:$0xff]  ;;  %v337_v8 = vld [vmem:[#allocation5 + $0x18] sm:$0xff] }
  0x11   :  { %v346_v7 = vld [vmem:[#allocation7 + $0x20] sm:$0xff]  ;;  %v336_v9 = vld [vmem:[#allocation5 + $0x10] sm:$0xff]  ;;  %v335_v10 = vld [vmem:[#allocation5 + $0x8] sm:$0xff] }
  0x12   :  { %v334_v11 = vld [vmem:[#allocation5] sm:$0xff]  ;;  %v333_v12 = vld [vmem:[#allocation2] sm:$0xff]  ;;  %v344_v14 = vld [vmem:[#allocation7 + $0x10] sm:$0xff] }
  0x13   :  { %145 = vmatpush.bf16.msra.mxu0 %v340_v1  ;;  %v345_v13 = vld [vmem:[#allocation7 + $0x18] sm:$0xff]  ;;  %v343_v15 = vld [vmem:[#allocation7 + $0x8] sm:$0xff]  ;;  %v342_v16 = vld [vmem:[#allocation7] sm:$0xff] }
  0x14   :  { %230 = vmatpush.bf16.msra.mxu1 %v348_v3  ;;  %v358_v18 = vld [vmem:[%s520_s2] ss:$0 sm:$0xff]  ;;  %s251_s2 = sshll.u32 %s523_s5, 4  ;;  %s252_s2 = int_to_ptr.hbm [resolvable:$true] %s251_s2 }
  0x15   :  { %v359_v25 = vld [vmem:[%s522_s4] ss:$0 sm:$0xff] }
  0x17   :  { %146 = vmatpush.bf16.msra.mxu0 %v339_v4 }
  0x18   :  { %231 = vmatpush.bf16.msra.mxu1 %v347_v5 }
  0x1b   :  { %147 = vmatpush.bf16.msra.mxu0 %v338_v6 }
  0x1c   :  { %232 = vmatpush.bf16.msra.mxu1 %v346_v7 }
  0x1f   :  { %148 = vmatpush.bf16.msra.mxu0 %v337_v8 }
  0x20   :  { %233 = vmatpush.bf16.msra.mxu1 %v345_v13 }
  0x23   :  { %149 = vmatpush.bf16.msra.mxu0 %v336_v9 }
  0x24   :  { %234 = vmatpush.bf16.msra.mxu1 %v344_v14 }
  0x27   :  { %150 = vmatpush.bf16.msra.mxu0 %v335_v10 }
  0x28   :  { %235 = vmatpush.bf16.msra.mxu1 %v343_v15 }
  0x2b   :  { %151 = vmatpush.bf16.msra.mxu0 %v334_v11 }
  0x2c   :  { %236 = vmatpush.bf16.msra.mxu1 %v342_v16 }
  0x2e   :  { %152 = vmatmul.bf16.vlgmr.msra.gmra.mxu0 %v333_v12 }
  0xab   :  { %v153_v17 = vpop.f32.mrf.mxu0 }
  0xac   :  { %v154_v19 = vadd.f32 %v358_v18, %v153_v17 }
  0xae   :  { %v158_v22 = vmax.f32 %v154_v19, 0.0 }
  0xb3   :  { %v155_v20 = vpop.f32.mrf.mxu0 }
  0xb4   :  { %v156_v21 = vadd.f32 %v358_v18, %v155_v20 }
  0xb6   :  { %v159_v23 = vmax.f32 %v156_v21, 0.0 }
  0xb8   :  { %v160_v24 = vpack.c.bf16 %v159_v23, %v158_v22 }
  0xba   :  { %237 = vmatmul.bf16.vlgmr.msra.gmra.mxu1 %v160_v24 }
 0x137   :  { %v238_v26 = vpop.f32.mrf.mxu1 }
 0x138   :  { %v239_v27 = vadd.f32 %v359_v25, %v238_v26 }
 0x13a   :  { %243 = vst [vmem:[#allocation8] sm:$0xff] %v239_v27 }
 0x13f   :  { %v240_v28 = vpop.f32.mrf.mxu1 }
 0x140   :  { %v241_v29 = vadd.f32 %v359_v25, %v240_v28 }
 0x142   :  { %244 = vst [vmem:[#allocation8 + $0x8] sm:$0xff] %v241_v29 }
 0x143   :  { %257 = dma.vmem_to_hbm [thread:$0]  %s250_s12, 256, %s252_s2, [#allocation4], %s468_s15, %s468_s15, %s469_s16  }
 0x144   :  { %460 = dma.done.wait [#allocation4], 256  }
 0x145   :  { %461 = vsyncadd [#allocation4], 4294967040 }
 0x146   :  { %262 = vsyncpa [#allocation3], 1 }
 0x147   :  { %263 = vsyncpa [#allocation6], 1 }
 0x148   :  { %264 = vsyncpa [#allocation4], 1 }

</bundles_post_ra>
